<compile_context>
chip_gen: v6e
topology: v6e:2x2x1
jax: 0.10.0
libtpu: 0.0.40
codegen_flags: <defaults>
</compile_context>

<pallas_src>
import jax
import jax.numpy as jnp
from jax.experimental import pallas as pl
from jax.experimental.pallas import tpu as pltpu


def _choose_k_tile(k_split: int, tk_max: int) -> int:
    """Largest multiple of 128 that divides k_split and is <= tk_max."""
    if k_split % 128 != 0:
        raise ValueError(f"K per split ({k_split}) must be a multiple of 128")
    cap = min(tk_max, k_split)
    best = 128
    t = 128
    while t <= cap:
        if k_split % t == 0:
            best = t
        t += 128
    return best


def _make_perceptron_kernel(fuse_epilogue: bool):
    """K-tiled x @ W^T with a resident f32 VMEM accumulator.

    Grid axis 0 = K-split ("parallel", megacore on v7x), axis 1 = K reduction
    ("arbitrary"). When fuse_epilogue is True (num_splits == 1), bias-add and
    PReLU are applied on the final K step; otherwise raw f32 partial sums are
    written and combined in the wrapper.
    """

    def kernel(x_ref, w_ref, b_ref, a_ref, o_ref, acc_ref):
        k = pl.program_id(1)

        @pl.when(k == 0)
        def _init():
            acc_ref[...] = jnp.zeros_like(acc_ref)

        # (B, tk) . (N, tk)^T -> (B, N), f32 accumulation on the MXU.
        acc_ref[...] += jax.lax.dot_general(
            x_ref[...],
            w_ref[...],
            dimension_numbers=(((1,), (1,)), ((), ())),
            preferred_element_type=jnp.float32,
        )

        @pl.when(k == pl.num_programs(1) - 1)
        def _finalize():
            res = acc_ref[...]
            if fuse_epilogue:
                z = res + b_ref[...]          # bias broadcast over batch rows
                alpha = a_ref[0]              # PReLU scalar read from SMEM
                res = jnp.where(z > 0, z, alpha * z)
            o_ref[0] = res.astype(o_ref.dtype)

    return kernel


def perceptron_forward(x_nchw, weight, bias, alpha, *,
                       tk_max=65536, num_splits=1,
                       compute_dtype=jnp.bfloat16):
    """
    x_nchw : (B, C, H, W)   input, flattened like torch's x.view(B, -1)
    weight : (N, K)         nn.Linear weight in PyTorch layout (out, in)
    bias   : (N,)           nn.Linear bias
    alpha  : scalar         PReLU parameter (nn.PReLU default: single param)
    """
    B = x_nchw.shape[0]
    x_flat = x_nchw.reshape(B, -1)            # == torch x.view(B, -1)
    N, K = weight.shape
    assert x_flat.shape[1] == K, "flattened input size must match weight K"
    assert K % num_splits == 0, "K must divide evenly across splits"

    k_split = K // num_splits
    tk = _choose_k_tile(k_split, tk_max)
    steps = k_split // tk

    # bf16 streaming operands; f32 accumulator / epilogue preserves accuracy.
    xc = x_flat.astype(compute_dtype)
    wc = weight.astype(compute_dtype)
    bias_2d = bias.reshape(1, N).astype(jnp.float32)
    alpha_sc = jnp.asarray(alpha, jnp.float32).reshape(1)

    fuse = (num_splits == 1)
    out_dtype = x_flat.dtype if fuse else jnp.float32

    itm = jnp.dtype(compute_dtype).itemsize
    cost = pl.CostEstimate(
        flops=2 * B * K * N,
        transcendentals=0,
        bytes_accessed=int((B * K + N * K) * itm
                           + num_splits * B * N * jnp.dtype(out_dtype).itemsize
                           + N * 4 + 4),
    )

    partials = pl.pallas_call(
        _make_perceptron_kernel(fuse),
        out_shape=jax.ShapeDtypeStruct((num_splits, B, N), out_dtype),
        grid_spec=pltpu.PrefetchScalarGridSpec(
            num_scalar_prefetch=0,
            grid=(num_splits, steps),
            in_specs=[
                # x: lane-dense (B, tk) slab over K
                pl.BlockSpec((B, tk), lambda p, k: (0, p * steps + k)),
                # W: lane-dense (N, tk) slab over K (contiguous rows in HBM)
                pl.BlockSpec((N, tk), lambda p, k: (0, p * steps + k)),
                # bias: tiny, resident in VMEM
                pl.BlockSpec((1, N), lambda p, k: (0, 0)),
                # PReLU alpha: scalar path (SMEM), no padded VMEM tile
                pl.BlockSpec(memory_space=pltpu.MemorySpace.SMEM),
            ],
            out_specs=pl.BlockSpec((1, B, N), lambda p, k: (p, 0, 0)),
            scratch_shapes=[pltpu.VMEM((B, N), jnp.float32)],
        ),
        compiler_params=pltpu.CompilerParams(
            dimension_semantics=("parallel", "arbitrary"),
        ),
        cost_estimate=cost,
    )(xc, wc, bias_2d, alpha_sc)

    if fuse:
        return partials[0]

    # v7x megacore path: combine per-core partial sums, then bias + PReLU.
    z = partials.sum(axis=0) + bias.astype(jnp.float32)[None, :]
    out = jnp.where(z > 0, z, jnp.asarray(alpha, jnp.float32) * z)
    return out.astype(x_flat.dtype)


if __name__ == "__main__":
    # Small shapes consistent with the module's forward (flatten -> linear -> PReLU).
    # The real module uses K = 786432 = 3*512*512 (which tiles as 12 x 65536);
    # here K = 3*16*16 = 768 for a fast synthetic run — the kernel tiles K
    # generically (multiples of 128).
    B, C, H, W = 2, 3, 16, 16
    K = C * H * W
    N_CLASSES = 10

    key = jax.random.PRNGKey(0)
    kx, kw, kb = jax.random.split(key, 3)

    x = jax.random.normal(kx, (B, C, H, W), dtype=jnp.float32)

    # nn.Linear-style uniform(-1/sqrt(K), 1/sqrt(K)) init; weight in (N, K) layout.
    bound = 1.0 / (K ** 0.5)
    weight = jax.random.uniform(kw, (N_CLASSES, K), jnp.float32, -bound, bound)
    bias = jax.random.uniform(kb, (N_CLASSES,), jnp.float32, -bound, bound)
    alpha = jnp.float32(0.25)                  # nn.PReLU() default init

    # Pure-JAX reference on bf16-rounded operands with f32 accumulation
    # (mirrors the kernel's numerics).
    xr = x.reshape(B, -1).astype(jnp.bfloat16).astype(jnp.float32)
    wr = weight.astype(jnp.bfloat16).astype(jnp.float32)
    z_ref = jnp.dot(xr, wr.T, precision=jax.lax.Precision.HIGHEST) + bias
    ref = jnp.where(z_ref > 0, z_ref, alpha * z_ref)

    # Default path: single reduction stream, epilogue fused in the kernel.
    out1 = jax.block_until_ready(perceptron_forward(x, weight, bias, alpha))
    assert out1.shape == (B, N_CLASSES)
    assert jnp.allclose(out1, ref, atol=1e-3, rtol=1e-3), "mismatch (fused path)"

    # Megacore path (v7x): K stream split across 2 cores, combined in wrapper.
    out2 = jax.block_until_ready(
        perceptron_forward(x, weight, bias, alpha, num_splits=2))
    assert out2.shape == (B, N_CLASSES)
    assert jnp.allclose(out2, ref, atol=1e-3, rtol=1e-3), "mismatch (split path)"

    print("KERNEL_OK")
</pallas_src>

<mosaic_0001>
module attributes {stable_mosaic.version = 11 : i64} {
  func.func @kernel(%arg0: i32, %arg1: i32, %arg2: memref<2x768xbf16, #tpu.memory_space<vmem>>, %arg3: memref<10x768xbf16, #tpu.memory_space<vmem>>, %arg4: memref<1x10xf32, #tpu.memory_space<vmem>>, %arg5: memref<1xf32, #tpu.memory_space<smem>>, %arg6: memref<1x2x10xf32, #tpu.memory_space<vmem>>, %arg7: memref<2x10xf32, #tpu.memory_space<vmem>>) attributes {dimension_semantics = [#tpu.dimension_semantics<parallel>, #tpu.dimension_semantics<arbitrary>], iteration_bounds = array<i64: 1, 1>, scalar_prefetch = 0 : i64, scratch_operands = 1 : i64, tpu.core_type = #tpu.core_type<tc>, window_params = [{transform_indices = @transform_0, window_bounds = array<i64: 2, 768>}, {transform_indices = @transform_1, window_bounds = array<i64: 10, 768>}, {pipeline_mode = #tpu.pipeline_mode<synchronous>, transform_indices = @transform_2, window_bounds = array<i64: 1, 10>}, {transform_indices = @transform_3, window_bounds = array<i64: 1>}, {transform_indices = @transform_4, window_bounds = array<i64: 1, 2, 10>}]} {
    %c0_i32 = arith.constant 0 : i32
    %0 = arith.cmpi eq, %arg1, %c0_i32 : i32
    %1 = arith.extui %0 : i1 to i32
    %c0_i32_0 = arith.constant 0 : i32
    %2 = arith.cmpi ne, %1, %c0_i32_0 : i32
    scf.if %2 {
      %cst_10 = arith.constant 0.000000e+00 : f32
      %12 = vector.broadcast %cst_10 : f32 to vector<2x10xf32>
      %c0_11 = arith.constant 0 : index
      %c0_12 = arith.constant 0 : index
      %13 = vector.load %arg7[%c0_11, %c0_12] : memref<2x10xf32, #tpu.memory_space<vmem>>, vector<2x10xf32>
      tpu.vector_store %arg7[%c0_11, %c0_12], %12 {strides = array<i32>} : memref<2x10xf32, #tpu.memory_space<vmem>>, vector<2x10xf32>,
    } else {
    }
    %c0 = arith.constant 0 : index
    %c0_1 = arith.constant 0 : index
    %3 = vector.load %arg7[%c0, %c0_1] : memref<2x10xf32, #tpu.memory_space<vmem>>, vector<2x10xf32>
    %c0_2 = arith.constant 0 : index
    %c0_3 = arith.constant 0 : index
    %4 = vector.load %arg2[%c0_2, %c0_3] : memref<2x768xbf16, #tpu.memory_space<vmem>>, vector<2x768xbf16>
    %c0_4 = arith.constant 0 : index
    %c0_5 = arith.constant 0 : index
    %5 = vector.load %arg3[%c0_4, %c0_5] : memref<10x768xbf16, #tpu.memory_space<vmem>>, vector<10x768xbf16>
    %cst = arith.constant dense<0.000000e+00> : vector<2x10xf32>
    %6 = tpu.matmul %4, %5, %cst {dimension_numbers = #tpu.dot_dimension_numbers<[1], [1], [0], [0], [0, 0, 1, 0], [], []>} : vector<2x768xbf16>, vector<10x768xbf16>, vector<2x10xf32> -> vector<2x10xf32>
    %7 = arith.addf %3, %6 : vector<2x10xf32>
    %c0_6 = arith.constant 0 : index
    %c0_7 = arith.constant 0 : index
    %8 = vector.load %arg7[%c0_6, %c0_7] : memref<2x10xf32, #tpu.memory_space<vmem>>, vector<2x10xf32>
    tpu.vector_store %arg7[%c0_6, %c0_7], %7 {strides = array<i32>} : memref<2x10xf32, #tpu.memory_space<vmem>>, vector<2x10xf32>,
    %c0_i32_8 = arith.constant 0 : i32
    %9 = arith.cmpi eq, %arg1, %c0_i32_8 : i32
    %10 = arith.extui %9 : i1 to i32
    %c0_i32_9 = arith.constant 0 : i32
    %11 = arith.cmpi ne, %10, %c0_i32_9 : i32
    scf.if %11 {
      %c0_10 = arith.constant 0 : index
      %c0_11 = arith.constant 0 : index
      %12 = vector.load %arg7[%c0_10, %c0_11] : memref<2x10xf32, #tpu.memory_space<vmem>>, vector<2x10xf32>
      %c0_12 = arith.constant 0 : index
      %c0_13 = arith.constant 0 : index
      %13 = vector.load %arg4[%c0_12, %c0_13] : memref<1x10xf32, #tpu.memory_space<vmem>>, vector<1x10xf32>
      %14 = vector.broadcast %13 : vector<1x10xf32> to vector<2x10xf32>
      %15 = arith.addf %12, %14 : vector<2x10xf32>
      %c0_14 = arith.constant 0 : index
      %16 = memref.load %arg5[%c0_14] : memref<1xf32, #tpu.memory_space<smem>>
      %cst_15 = arith.constant 0.000000e+00 : f32
      %17 = vector.broadcast %cst_15 : f32 to vector<2x10xf32>
      %18 = arith.cmpf ogt, %15, %17 : vector<2x10xf32>
      %19 = vector.broadcast %16 : f32 to vector<2x10xf32>
      %20 = arith.mulf %19, %15 : vector<2x10xf32>
      %21 = arith.select %18, %15, %20 : vector<2x10xi1>, vector<2x10xf32>
      %c0_16 = arith.constant 0 : index
      %c0_17 = arith.constant 0 : index
      %c0_18 = arith.constant 0 : index
      %22 = vector.load %arg6[%c0_16, %c0_17, %c0_18] : memref<1x2x10xf32, #tpu.memory_space<vmem>>, vector<1x2x10xf32>
      %23 = vector.shape_cast %22 : vector<1x2x10xf32> to vector<2x10xf32>
      %24 = vector.shape_cast %21 : vector<2x10xf32> to vector<1x2x10xf32>
      tpu.vector_store %arg6[%c0_16, %c0_17, %c0_18], %24 {strides = array<i32>} : memref<1x2x10xf32, #tpu.memory_space<vmem>>, vector<1x2x10xf32>,
    } else {
    }
    return
  }
  func.func @transform_0(%arg0: i32, %arg1: i32) -> (i32, i32) {
    %c1_i32 = arith.constant 1 : i32
    %0 = arith.muli %arg0, %c1_i32 : i32
    %1 = arith.addi %0, %arg1 : i32
    %c0_i32 = arith.constant 0 : i32
    %c0_i32_0 = arith.constant 0 : i32
    return %c0_i32, %1 : i32, i32
  }
  func.func @transform_1(%arg0: i32, %arg1: i32) -> (i32, i32) {
    %c1_i32 = arith.constant 1 : i32
    %0 = arith.muli %arg0, %c1_i32 : i32
    %1 = arith.addi %0, %arg1 : i32
    %c0_i32 = arith.constant 0 : i32
    %c0_i32_0 = arith.constant 0 : i32
    return %c0_i32, %1 : i32, i32
  }
  func.func @transform_2(%arg0: i32, %arg1: i32) -> (i32, i32) {
    %c0_i32 = arith.constant 0 : i32
    %c0_i32_0 = arith.constant 0 : i32
    %c0_i32_1 = arith.constant 0 : i32
    return %c0_i32, %c0_i32_0 : i32, i32
  }
  func.func @transform_3(%arg0: i32, %arg1: i32) -> i32 {
    %c0_i32 = arith.constant 0 : i32
    %c0_i32_0 = arith.constant 0 : i32
    return %c0_i32 : i32
  }
  func.func @transform_4(%arg0: i32, %arg1: i32) -> (i32, i32, i32) {
    %c0_i32 = arith.constant 0 : i32
    %c0_i32_0 = arith.constant 0 : i32
    %c0_i32_1 = arith.constant 0 : i32
    return %arg0, %c0_i32, %c0_i32_0 : i32, i32, i32
  }
}

</mosaic_0001>

<bundles_post_ra>
// kernel: tpu_custom_call.1
= control target key start
LH: loop header
LB: loop body
LE: loop exit
PB: predicated region body
PF: predicated region fallthrough
CT: control target
= control target key end

     0   :  { %10 = vsyncpa [#allocation5], 0  ;;  %s453_s0 = inlined_call_operand.hbm [shape: bf16[2,768], index: 0, kind: input, shape index: {}]   ;;  %s454_s1 = inlined_call_operand.hbm [shape: bf16[10,768], index: 1, kind: input, shape index: {}]   ;;  %s455_s2 = inlined_call_operand.vmem [shape: f32[1,10], index: 2, kind: input, shape index: {}]   ;;  %s456_s3 = inlined_call_operand.<no memory space> [shape: f32[1], index: 3, kind: input, shape index: {}]   ;;  %s457_s4 = inlined_call_operand.hbm [shape: f32[1,2,10], index: 4, kind: output, shape index: {}]  }
   0x1   :  { %11 = vsyncpa [#allocation8], 0 }
   0x2   :  { %12 = vsyncpa [#allocation6], 0  ;;  %s403_s15 = smov [#allocation4]   ;;  %s404_s17 = smov [#allocation7]  }
   0x3   :  { %s23_s16 = sshll.u32 %s403_s15, 4  ;;  %s36_s18 = sshll.u32 %s404_s17, 4  ;;  %s24_s16 = int_to_ptr.vmem [resolvable:$true] %s23_s16  ;;  %s37_s18 = int_to_ptr.vmem [resolvable:$true] %s36_s18 }
   0x4   :  { %s345_s19 = scalar_lea.vmem %s24_s16, 96  ;;  %p350_p1 = scmp.lt.s32.totalorder %s24_s16, %s24_s16 }
   0x5   :  { %p346_p0 = scmp.ne.s32.totalorder %s24_s16, %s345_s19  ;;  %p351_p2 = scmp.lt.s32.totalorder %s345_s19, %s345_s19 }
   0x7   :  { %p352_p3 = por %p351_p2, %p350_p1 }
   0x9   :  { %p353_p4 = pnand %p352_p3, %p346_p0 }
   0xb   :  { %356 = shalt.err (!%p353_p4)
}
   0xc   :  { %26 = dma.hbm_to_vmem [thread:$0]  %s453_s0, 96, %s24_s16, [#allocation5]  }
   0xd   :  { %s365_s22 = scalar_lea.vmem %s37_s18, 768  ;;  %p370_p6 = scmp.lt.s32.totalorder %s37_s18, %s37_s18 }
   0xe   :  { %p366_p5 = scmp.ne.s32.totalorder %s37_s18, %s365_s22  ;;  %p371_p7 = scmp.lt.s32.totalorder %s365_s22, %s365_s22 }
  0x10   :  { %p372_p8 = por %p371_p7, %p370_p6 }
  0x12   :  { %p373_p9 = pnand %p372_p8, %p366_p5 }
  0x14   :  { %376 = shalt.err (!%p373_p9)
}
  0x15   :  { %s405_s23 = smov 384   ;;  %s406_s24 = smov 24  }
  0x16   :  { %42 = dma.hbm_to_vmem [thread:$0]  %s454_s1, 768, %s37_s18, [#allocation8], %s405_s23, %s405_s23, %s406_s24  }
  0x17   :  { %397 = dma.done.wait [#allocation5], 96  }
  0x18   :  { %398 = vsyncadd [#allocation5], 4294967200 }
  0x19   :  { %399 = dma.done.wait [#allocation8], 768  }
  0x1a   :  { %400 = vsyncadd [#allocation8], 4294966528  ;;  %v77_v0 = vlaneseq  ;;  %v407_v1 = vmov 1966171168   ;;  %v65_v10 = vld [vmem:[#allocation4] sm:$0x3f]  ;;  %v293_v43 = vstv %s456_s3 }
  0x1b   :  { %v75_v2 = vunpack.c.l.s4 %v407_v1  ;;  %v327_v5 = vld [vmem:[#allocation7 + $0x4] ss:$24 sps:$4 sm:$0x1f]   ;;  %v329_v7 = vld [vmem:[#allocation7] ss:$24 sps:$4 sm:$0x1f]   ;;  %v73_v11 = vcombine.high %v65_v10, %v65_v10 }
  0x1c   :  { %v78_v4 = vshrl.u32 %v77_v0, 7  ;;  %170 = vmatprep.subr.bf16.mxu0 %v327_v5  ;;  %v330_v8 = vld [vmem:[#allocation7 + $0xc] ss:$24 sps:$4 sm:$0x1f]   ;;  %vm62_vm0 = vcmask 74752   ;;  %v408_v24 = vmov 0.0  }
  0x1d   :  { %v76_v3 = vunpack.c.0.s8 %v75_v2  ;;  %v332_v9 = vld [vmem:[#allocation7 + $0x8] ss:$24 sps:$4 sm:$0x1f]   ;;  %171 = vmatpush1.bf16.xpose.msra.mxu0 %v329_v7  ;;  %210 = vmatprep.subr.bf16.mxu1 %v330_v8  ;;  %v336_v13 = vld [vmem:[#allocation7 + $0x14] ss:$24 sps:$4 sm:$0x1f]  }
  0x1e   :  { %211 = vmatpush1.bf16.xpose.msra.mxu1 %v332_v9  ;;  %250 = vmatprep.subr.bf16.mxu0 %v336_v13  ;;  %v334_v18 = vld [vmem:[#allocation7 + $0x10] ss:$24 sps:$4 sm:$0x1f]   ;;  %63 = vst.msk [vmem:[#allocation2] sm:$0x3] %vm62_vm0, %v408_v24  ;;  %s409_s29 = smov [#allocation9]  }
  0x1f   :  { %v79_v6 = vsub.s32 %v76_v3, %v78_v4  ;;  %v319_v41 = vld [vmem:[%s455_s2] ss:$0 sm:$0xff]  ;;  %s303_s30 = sshll.u32 %s409_s29, 4  ;;  %s304_s30 = int_to_ptr.vmem [resolvable:$true] %s303_s30 }
  0x20   :  { %s377_s5 = scalar_lea.vmem %s304_s30, 32  ;;  %p382_p11 = scmp.lt.s32.totalorder %s304_s30, %s304_s30 }
  0x21   :  { %v80_v12 = vrot.slane %v65_v10, %v79_v6  ;;  %v87_v16 = vrot.slane %v73_v11, %v79_v6  ;;  %p378_p10 = scmp.ne.s32.totalorder %s304_s30, %s377_s5  ;;  %p383_p12 = scmp.lt.s32.totalorder %s377_s5, %s377_s5 }
  0x23   :  { %v88_v14 = vcombine.high %v80_v12, %v80_v12  ;;  %v96_v15 = vrot.slane %v80_v12, %v79_v6  ;;  %v89_v19 = vcombine.high %v87_v16, %v87_v16  ;;  %v103_v23 = vrot.slane %v87_v16, %v79_v6  ;;  %p384_p13 = por %p383_p12, %p382_p11 }
  0x25   :  { %v110_v17 = vrot.slane %v88_v14, %v79_v6  ;;  %v118_v20 = vcombine.high %v96_v15, %v96_v15  ;;  %v117_v22 = vrot.slane %v89_v19, %v79_v6  ;;  %v64_v34 = vld [vmem:[#allocation2] sm:$0x3]  ;;  %p385_p0 = pnand %p384_p13, %p378_p10 }
  0x27   :  { %188 = vmatprep.mubr.bf16.mxu0 %v110_v17  ;;  %v119_v21 = vcombine.high %v110_v17, %v110_v17 }
  0x28   :  { %189 = vmatmul.mubr.bf16.vlgmr.msra.gmra.mxu0 %v96_v15 }
  0x29   :  { %228 = vmatprep.mubr.bf16.mxu1 %v119_v21  ;;  %251 = vmatpush1.bf16.xpose.msra.mxu0 %v334_v18 }
  0x2a   :  { %229 = vmatmul.mubr.bf16.vlgmr.msra.gmra.mxu1 %v118_v20  ;;  %268 = vmatprep.mubr.bf16.mxu0 %v117_v22 }
  0x30   :  { %269 = vmatmul.mubr.bf16.vlgmr.msra.gmra.mxu0 %v103_v23 }
  0xe8   :  { %v190_v25 = vpop.f32.mrf.mxu0 }
  0xea   :  { %v230_v26 = vpop.f32.mrf.mxu1  ;;  %v192_v27 = vpop.f32.mrf.mxu0 }
  0xeb   :  { %v231_v32 = vadd.f32 %v230_v26, %v190_v25 }
  0xec   :  { %v232_v28 = vpop.f32.mrf.mxu1  ;;  %v193_v29 = vpop.f32.mrf.mxu0 }
  0xee   :  { %v233_v30 = vpop.f32.mrf.mxu1  ;;  %v194_v31 = vpop.f32.mrf.mxu0 }
  0xf0   :  { %v234_v33 = vpop.f32.mrf.mxu1  ;;  %v270_v35 = vpop.f32.mrf.mxu0 }
  0xf1   :  { %v271_v36 = vadd.f32 %v270_v35, %v231_v32 }
  0xf2   :  { %v272_v37 = vpop.f32.mrf.mxu0 }
  0xf3   :  { %v276_v38 = vadd.f32 %v271_v36, %v64_v34 }
  0xf4   :  { %v273_v39 = vpop.f32.mrf.mxu0 }
  0xf5   :  { %278 = vst.msk [vmem:[#allocation2] sm:$0x3] %vm62_vm0, %v276_v38 }
  0xf6   :  { %v274_v40 = vpop.f32.mrf.mxu0 }
  0xfc   :  { %v282_v42 = vld [vmem:[#allocation2] sm:$0x3] }
  0xfd   :  { %v290_v44 = vadd.f32 %v319_v41, %v282_v42 }
  0xff   :  { %vm292_vm1 = vcmp.gt.f32.partialorder %v290_v44, 0.0  ;;  %v294_v45 = vmul.f32 %v293_v43, %v290_v44 }
 0x101   :  { %v295_v46 = vsel %vm292_vm1, %v290_v44, %v294_v45 }
 0x102   :  { %296 = vst.msk [vmem:[#allocation9] sm:$0x3] %vm62_vm0, %v295_v46 }
 0x103   :  { %388 = shalt.err (!%p385_p0)
}
 0x104   :  { %306 = dma.vmem_to_hbm [thread:$0]  %s304_s30, 32, %s457_s4, [#allocation6]  }
 0x105   :  { %401 = dma.done.wait [#allocation6], 32  }
 0x106   :  { %402 = vsyncadd [#allocation6], 4294967264 }
 0x107   :  { %310 = vsyncpa [#allocation5], 1 }
 0x108   :  { %311 = vsyncpa [#allocation8], 1 }
 0x109   :  { %312 = vsyncpa [#allocation6], 1 }

</bundles_post_ra>
